<compile_context>
chip_gen: v5e
topology: v5e:2x2
jax: 0.10.0
libtpu: 0.0.40
codegen_flags: <defaults>
</compile_context>

<pallas_src>
import functools

import jax
import jax.numpy as jnp
from jax.experimental import pallas as pl
from jax.experimental.pallas import tpu as pltpu


def _round_up(n, m):
    return ((n + m - 1) // m) * m


def _plan_tiles(T, hp, dp, budget_bytes=40 * 1024 * 1024):
    """Pick (tq, tk, Tp, tr).

    tq: query-row tile, tk: sequence-contraction tile, Tp: padded sequence
    length (multiple of both), tr: row tile of the setup kernel.  The residency
    estimate targets ~40 MiB of (double-buffered) VMEM so the kernel fits on
    every generation (v7x: 64 MiB physical); raise on v5e/v6e if desired.
    """

    def residency(tq, tk):
        return (2 * tq * tk * 2            # exp(wbias) tile (bf16, 2 buffers)
                + 2 * tk * 2 * hp * 2      # [exp(K)V | exp(K)] tile (bf16)
                + 2 * tq * hp * 2          # sigmoid(Q) tile (bf16)
                + 2 * hp * dp * 4          # Wp (f32, grid-invariant)
                + 2 * dp * 4               # bp
                + 2 * tq * dp * 4          # output tile (f32)
                + tq * 2 * hp * 4)         # num|den f32 accumulator scratch

    if T <= 256:
        tq = _round_up(T, 8)
        Tp = tq
        tk = Tp
    else:
        tq = 256
        cap = _round_up(T, 256)
        tk = 256
        for cand in (4096, 2048, 1024, 512, 256):
            if cand <= cap and residency(tq, cand) <= budget_bytes:
                tk = cand
                break
        Tp = _round_up(T, tk)
    tr = min(256, Tp)
    return tq, tk, Tp, tr


def qkv_setup_kernel(x_ref, wqkv_ref, bqkv_ref, qsig_ref, kvn_ref, *, hp):
    """Grid (B, Tp//tr): fused QKV projection for one row tile of one batch.

    Writes sigmoid(Q) and [exp(K)*V | exp(K)] in bf16 (the bf16 MXU operands of
    the main kernel).
    """
    x = x_ref[0]                                                # (tr, dp) f32
    qkv = jnp.dot(x, wqkv_ref[...],
                  preferred_element_type=jnp.float32) + bqkv_ref[...]
    q = qkv[:, :hp]
    k = qkv[:, hp:2 * hp]
    v = qkv[:, 2 * hp:]
    qsig_ref[0] = jax.nn.sigmoid(q).astype(qsig_ref.dtype)
    ek = jnp.exp(k)                    # matches torch.exp (no max-subtraction)
    kvn_ref[0] = jnp.concatenate([ek * v, ek], axis=-1).astype(kvn_ref.dtype)


def aft_attn_kernel(expw_ref, kvn_ref, qsig_ref, wp_ref, bp_ref, out_ref,
                    nd_ref, *, hp):
    """Grid (Tp//tq, B, Tp//tk): fused num|den matmul + output projection.

    expw_ref: (tq, tk)      bf16   exp(wbias) tile (zero-padded outside [0,T))
    kvn_ref:  (1, tk, 2*hp) bf16   [exp(K)*V | exp(K)] rows for this k tile
    qsig_ref: (1, tq, hp)   bf16   sigmoid(Q) rows for this q tile
    wp_ref:   (hp, dp)      f32    output projection
    bp_ref:   (1, dp)       f32
    out_ref:  (1, tq, dp)   f32
    nd_ref:   (tq, 2*hp)    f32    VMEM accumulator for [num | den]
    """
    kk = pl.program_id(2)

    @pl.when(kk == 0)
    def _():
        nd_ref[...] = jnp.zeros_like(nd_ref)

    # bf16 x bf16 MXU matmul with f32 accumulation (dominant O(T^2*hp) work).
    nd_ref[...] += jnp.dot(expw_ref[...], kvn_ref[0],
                           preferred_element_type=jnp.float32)

    @pl.when(kk == pl.num_programs(2) - 1)
    def _():
        nd = nd_ref[...]
        num = nd[:, :hp]
        den = nd[:, hp:]
        q_sig = qsig_ref[0].astype(jnp.float32)
        yt = q_sig * (num * pl.reciprocal(den, approx=True))
        out = jnp.dot(yt, wp_ref[...],
                      preferred_element_type=jnp.float32) + bp_ref[...]
        out_ref[0] = out.astype(out_ref.dtype)


def aft_full_forward(x, params):
    """x: (B, T, dim) float32. params: dict of weights. Returns (B, T, dim)."""
    B, T, dim = x.shape
    H = params["wq"].shape[1]

    dp = _round_up(dim, 128)
    hp = _round_up(H, 128)
    tq, tk, Tp, tr = _plan_tiles(T, hp, dp)

    def pad2(w, r, c):
        return jnp.pad(w, ((0, r - w.shape[0]), (0, c - w.shape[1])))

    # Fused [Wq | Wk | Wv], zero-padded (exact) and lane-dense.
    wqkv = jnp.concatenate([pad2(params["wq"], dim, hp),
                            pad2(params["wk"], dim, hp),
                            pad2(params["wv"], dim, hp)], axis=1)
    wqkv = jnp.pad(wqkv, ((0, dp - dim), (0, 0)))                   # (dp, 3hp)
    bqkv = jnp.concatenate([pad2(params["bq"], 1, hp),
                            pad2(params["bk"], 1, hp),
                            pad2(params["bv"], 1, hp)], axis=1)     # (1, 3hp)
    wp = pad2(params["wp"], hp, dp)                                 # (hp, dp)
    bp = pad2(params["bp"], 1, dp)                                  # (1, dp)

    xp = jnp.pad(x, ((0, 0), (0, Tp - T), (0, dp - dim)))           # (B,Tp,dp)

    # Hoisted & zero-padded exp(wbias): padded rows/cols are 0 (NOT exp(0)=1),
    # so padded sequence positions contribute nothing to num/den.  bf16 MXU
    # operand -> half the HBM traffic of f32.
    expw = jnp.exp(params["wbias"][:T, :T].astype(jnp.float32))
    expw = jnp.pad(expw, ((0, Tp - T), (0, Tp - T))).astype(jnp.bfloat16)

    vmem_limit = 48 * 1024 * 1024  # safe on v5e/v6e/v7x (v7x physical 64 MiB)

    # ---- setup kernel: sigmoid(Q), [exp(K)V | exp(K)] -> bf16 in HBM -------
    nr = Tp // tr
    setup_cost = pl.CostEstimate(
        flops=int(B * 2 * Tp * dp * 3 * hp),
        transcendentals=int(B * Tp * 2 * hp),
        bytes_accessed=int(4 * B * Tp * dp + 4 * (dp * 3 * hp + 3 * hp)
                           + 2 * B * Tp * 3 * hp),
    )
    qsig, kvn = pl.pallas_call(
        functools.partial(qkv_setup_kernel, hp=hp),
        out_shape=(jax.ShapeDtypeStruct((B, Tp, hp), jnp.bfloat16),
                   jax.ShapeDtypeStruct((B, Tp, 2 * hp), jnp.bfloat16)),
        grid_spec=pltpu.PrefetchScalarGridSpec(
            num_scalar_prefetch=0,
            grid=(B, nr),
            in_specs=[
                pl.BlockSpec((1, tr, dp), lambda b, r: (b, r, 0)),   # x rows
                pl.BlockSpec((dp, 3 * hp), lambda b, r: (0, 0)),     # Wqkv
                pl.BlockSpec((1, 3 * hp), lambda b, r: (0, 0)),      # bqkv
            ],
            out_specs=[
                pl.BlockSpec((1, tr, hp), lambda b, r: (b, r, 0)),   # sigmoid(Q)
                pl.BlockSpec((1, tr, 2 * hp), lambda b, r: (b, r, 0)),  # kvn
            ],
        ),
        compiler_params=pltpu.CompilerParams(
            dimension_semantics=("parallel", "parallel"),
            vmem_limit_bytes=vmem_limit,
        ),
        cost_estimate=setup_cost,
    )(xp, wqkv, bqkv)

    # ---- main kernel: fused num|den matmul (bf16 MXU) + output projection --
    nq = Tp // tq
    nk = Tp // tk
    main_cost = pl.CostEstimate(
        flops=int(B * 2 * Tp * Tp * 2 * hp + B * 2 * Tp * hp * dp),
        transcendentals=0,
        bytes_accessed=int(2 * B * Tp * Tp               # expw (worst case, per b)
                           + 2 * nq * B * Tp * 2 * hp    # kvn re-streamed per q tile
                           + 2 * B * Tp * hp             # sigmoid(Q)
                           + 4 * (hp * dp + dp)          # Wp, bp
                           + 4 * B * Tp * dp),           # output writeback
    )
    # NOTE: Wp/bp are grid-invariant and could be single-buffered via
    # pipeline_mode=pl.Buffered(1); with the QKV setup hoisted, residency
    # already fits comfortably, so default buffering is kept for portability.
    out = pl.pallas_call(
        functools.partial(aft_attn_kernel, hp=hp),
        out_shape=jax.ShapeDtypeStruct((B, Tp, dp), jnp.float32),
        grid_spec=pltpu.PrefetchScalarGridSpec(
            num_scalar_prefetch=0,
            grid=(nq, B, nk),
            in_specs=[
                pl.BlockSpec((tq, tk), lambda qi, b, kk: (qi, kk)),        # expw
                pl.BlockSpec((1, tk, 2 * hp), lambda qi, b, kk: (b, kk, 0)),  # kvn
                pl.BlockSpec((1, tq, hp), lambda qi, b, kk: (b, qi, 0)),   # qsig
                pl.BlockSpec((hp, dp), lambda qi, b, kk: (0, 0)),          # Wp
                pl.BlockSpec((1, dp), lambda qi, b, kk: (0, 0)),           # bp
            ],
            out_specs=pl.BlockSpec((1, tq, dp), lambda qi, b, kk: (b, qi, 0)),
            scratch_shapes=[pltpu.VMEM((tq, 2 * hp), jnp.float32)],
        ),
        compiler_params=pltpu.CompilerParams(
            dimension_semantics=("parallel", "parallel", "arbitrary"),
            vmem_limit_bytes=vmem_limit,
        ),
        cost_estimate=main_cost,
    )(expw, kvn, qsig, wp, bp)

    return out[:, :T, :dim]


def init_params(key, max_seqlen, dim, hidden_dim):
    """Deterministic synthetic parameters (shapes match the PyTorch module)."""
    ks = jax.random.split(key, 9)

    def xavier(k, fan_in, fan_out, shape):
        limit = (6.0 / (fan_in + fan_out)) ** 0.5
        return jax.random.uniform(k, shape, jnp.float32, -limit, limit)

    return {
        # Linear weights stored as (in, out); biases as (1, out).
        "wq": xavier(ks[0], dim, hidden_dim, (dim, hidden_dim)),
        "bq": xavier(ks[1], dim, hidden_dim, (1, hidden_dim)) * 0.1,
        "wk": xavier(ks[2], dim, hidden_dim, (dim, hidden_dim)),
        "bk": xavier(ks[3], dim, hidden_dim, (1, hidden_dim)) * 0.1,
        "wv": xavier(ks[4], dim, hidden_dim, (dim, hidden_dim)),
        "bv": xavier(ks[5], dim, hidden_dim, (1, hidden_dim)) * 0.1,
        "wp": xavier(ks[6], hidden_dim, dim, (hidden_dim, dim)),
        "bp": xavier(ks[7], hidden_dim, dim, (1, dim)) * 0.1,
        "wbias": xavier(ks[8], max_seqlen, max_seqlen, (max_seqlen, max_seqlen)),
    }


def aft_full_reference(x, params):
    """Pure-JAX reference mirroring the PyTorch forward exactly (f32)."""
    B, T, _ = x.shape
    q = jnp.einsum("btd,dh->bth", x, params["wq"]) + params["bq"]
    k = jnp.einsum("btd,dh->bth", x, params["wk"]) + params["bk"]
    v = jnp.einsum("btd,dh->bth", x, params["wv"]) + params["bv"]
    wb = jnp.exp(params["wbias"][:T, :T])[None]               # (1, T, T)
    q_sig = jax.nn.sigmoid(q)
    num = jnp.einsum("bts,bsh->bth", jnp.broadcast_to(wb, (B, T, T)), jnp.exp(k) * v)
    den = jnp.einsum("bts,bsh->bth", jnp.broadcast_to(wb, (B, T, T)), jnp.exp(k))
    yt = q_sig * (num / den)
    return jnp.einsum("bth,hd->btd", yt, params["wp"]) + params["bp"]


if __name__ == "__main__":
    B, T, dim, hidden_dim, max_seqlen = 2, 8, 32, 64, 16

    key = jax.random.PRNGKey(0)
    kx, kp = jax.random.split(key)
    x = jax.random.normal(kx, (B, T, dim), jnp.float32)
    params = init_params(kp, max_seqlen, dim, hidden_dim)

    out = aft_full_forward(x, params)
    out = jax.block_until_ready(out)

    ref = aft_full_reference(x, params)
    assert out.shape == (B, T, dim)
    # Tolerance accounts for bf16 MXU operands (expw / kvn / qsig) and the EUP
    # approximate reciprocal; accumulation and the output projection are f32.
    assert jnp.allclose(out, ref, atol=2e-2, rtol=2e-2), "mismatch vs reference"

    print("KERNEL_OK")
</pallas_src>

<mosaic_0001>
module attributes {stable_mosaic.version = 11 : i64} {
  func.func @qkv_setup_kernel(%arg0: i32, %arg1: i32, %arg2: memref<1x8x128xf32, #tpu.memory_space<vmem>>, %arg3: memref<128x384xf32, #tpu.memory_space<vmem>>, %arg4: memref<1x384xf32, #tpu.memory_space<vmem>>, %arg5: memref<1x8x128xbf16, #tpu.memory_space<vmem>>, %arg6: memref<1x8x256xbf16, #tpu.memory_space<vmem>>) attributes {dimension_semantics = [#tpu.dimension_semantics<parallel>, #tpu.dimension_semantics<parallel>], iteration_bounds = array<i64: 2, 1>, scalar_prefetch = 0 : i64, scratch_operands = 0 : i64, tpu.core_type = #tpu.core_type<tc>, window_params = [{transform_indices = @transform_0, window_bounds = array<i64: 1, 8, 128>}, {pipeline_mode = #tpu.pipeline_mode<synchronous>, transform_indices = @transform_1, window_bounds = array<i64: 128, 384>}, {pipeline_mode = #tpu.pipeline_mode<synchronous>, transform_indices = @transform_2, window_bounds = array<i64: 1, 384>}, {transform_indices = @transform_3, window_bounds = array<i64: 1, 8, 128>}, {transform_indices = @transform_4, window_bounds = array<i64: 1, 8, 256>}]} {
    %c0 = arith.constant 0 : index
    %c0_0 = arith.constant 0 : index
    %c0_1 = arith.constant 0 : index
    %0 = vector.load %arg2[%c0, %c0_0, %c0_1] : memref<1x8x128xf32, #tpu.memory_space<vmem>>, vector<1x8x128xf32>
    %1 = vector.shape_cast %0 : vector<1x8x128xf32> to vector<8x128xf32>
    %c0_2 = arith.constant 0 : index
    %c0_3 = arith.constant 0 : index
    %2 = vector.load %arg3[%c0_2, %c0_3] : memref<128x384xf32, #tpu.memory_space<vmem>>, vector<128x384xf32>
    %cst = arith.constant dense<0.000000e+00> : vector<8x384xf32>
    %3 = tpu.matmul %1, %2, %cst {dimension_numbers = #tpu.dot_dimension_numbers<[1], [0], [0], [1], [0, 0, 1, 1], [], []>} : vector<8x128xf32>, vector<128x384xf32>, vector<8x384xf32> -> vector<8x384xf32>
    %c0_4 = arith.constant 0 : index
    %c0_5 = arith.constant 0 : index
    %4 = vector.load %arg4[%c0_4, %c0_5] : memref<1x384xf32, #tpu.memory_space<vmem>>, vector<1x384xf32>
    %5 = vector.broadcast %4 : vector<1x384xf32> to vector<8x384xf32>
    %6 = arith.addf %3, %5 : vector<8x384xf32>
    %7 = vector.extract_strided_slice %6 {offsets = [0, 0], sizes = [8, 128], strides = [1, 1]} : vector<8x384xf32> to vector<8x128xf32>
    %8 = vector.extract_strided_slice %6 {offsets = [0, 128], sizes = [8, 128], strides = [1, 1]} : vector<8x384xf32> to vector<8x128xf32>
    %9 = vector.extract_strided_slice %6 {offsets = [0, 256], sizes = [8, 128], strides = [1, 1]} : vector<8x384xf32> to vector<8x128xf32>
    %10 = arith.negf %7 : vector<8x128xf32>
    %11 = math.exp %10 : vector<8x128xf32>
    %cst_6 = arith.constant 1.000000e+00 : f32
    %12 = vector.broadcast %cst_6 : f32 to vector<8x128xf32>
    %13 = arith.addf %12, %11 : vector<8x128xf32>
    %14 = arith.divf %12, %13 : vector<8x128xf32>
    %15 = arith.truncf %14 : vector<8x128xf32> to vector<8x128xbf16>
    %c0_7 = arith.constant 0 : index
    %c0_8 = arith.constant 0 : index
    %c0_9 = arith.constant 0 : index
    %16 = vector.load %arg5[%c0_7, %c0_8, %c0_9] : memref<1x8x128xbf16, #tpu.memory_space<vmem>>, vector<1x8x128xbf16>
    %17 = vector.shape_cast %16 : vector<1x8x128xbf16> to vector<8x128xbf16>
    %18 = vector.shape_cast %15 : vector<8x128xbf16> to vector<1x8x128xbf16>
    tpu.vector_store %arg5[%c0_7, %c0_8, %c0_9], %18 {strides = array<i32>} : memref<1x8x128xbf16, #tpu.memory_space<vmem>>, vector<1x8x128xbf16>,
    %19 = math.exp %8 : vector<8x128xf32>
    %20 = arith.mulf %19, %9 : vector<8x128xf32>
    %21 = tpu.concatenate %20, %19 in 1 : vector<8x128xf32>, vector<8x128xf32> -> vector<8x256xf32>
    %22 = arith.truncf %21 : vector<8x256xf32> to vector<8x256xbf16>
    %c0_10 = arith.constant 0 : index
    %c0_11 = arith.constant 0 : index
    %c0_12 = arith.constant 0 : index
    %23 = vector.load %arg6[%c0_10, %c0_11, %c0_12] : memref<1x8x256xbf16, #tpu.memory_space<vmem>>, vector<1x8x256xbf16>
    %24 = vector.shape_cast %23 : vector<1x8x256xbf16> to vector<8x256xbf16>
    %25 = vector.shape_cast %22 : vector<8x256xbf16> to vector<1x8x256xbf16>
    tpu.vector_store %arg6[%c0_10, %c0_11, %c0_12], %25 {strides = array<i32>} : memref<1x8x256xbf16, #tpu.memory_space<vmem>>, vector<1x8x256xbf16>,
    return
  }
  func.func @transform_0(%arg0: i32, %arg1: i32) -> (i32, i32, i32) {
    %c0_i32 = arith.constant 0 : i32
    %c0_i32_0 = arith.constant 0 : i32
    return %arg0, %arg1, %c0_i32 : i32, i32, i32
  }
  func.func @transform_1(%arg0: i32, %arg1: i32) -> (i32, i32) {
    %c0_i32 = arith.constant 0 : i32
    %c0_i32_0 = arith.constant 0 : i32
    %c0_i32_1 = arith.constant 0 : i32
    return %c0_i32, %c0_i32_0 : i32, i32
  }
  func.func @transform_2(%arg0: i32, %arg1: i32) -> (i32, i32) {
    %c0_i32 = arith.constant 0 : i32
    %c0_i32_0 = arith.constant 0 : i32
    %c0_i32_1 = arith.constant 0 : i32
    return %c0_i32, %c0_i32_0 : i32, i32
  }
  func.func @transform_3(%arg0: i32, %arg1: i32) -> (i32, i32, i32) {
    %c0_i32 = arith.constant 0 : i32
    %c0_i32_0 = arith.constant 0 : i32
    return %arg0, %arg1, %c0_i32 : i32, i32, i32
  }
  func.func @transform_4(%arg0: i32, %arg1: i32) -> (i32, i32, i32) {
    %c0_i32 = arith.constant 0 : i32
    %c0_i32_0 = arith.constant 0 : i32
    return %arg0, %arg1, %c0_i32 : i32, i32, i32
  }
}

</mosaic_0001>

<bundles_post_ra>
// kernel: tpu_custom_call.1
= control target key start
LH: loop header
LB: loop body
LE: loop exit
PB: predicated region body
PF: predicated region fallthrough
CT: control target
= control target key end

     0   :  { %10 = vsyncpa [#allocation3], 0  ;;  %s1118_s0 = inlined_call_operand.hbm [shape: f32[2,8,128], index: 0, kind: input, shape index: {}]   ;;  %s1119_s1 = inlined_call_operand.hbm [shape: f32[128,384], index: 1, kind: input, shape index: {}]   ;;  %s1120_s2 = inlined_call_operand.hbm [shape: f32[1,384], index: 2, kind: input, shape index: {}]   ;;  %s1121_s3 = inlined_call_operand.hbm [shape: bf16[2,8,128], index: 3, kind: output, shape index: {0}]   ;;  %s1122_s4 = inlined_call_operand.hbm [shape: bf16[2,8,256], index: 4, kind: output, shape index: {1}]  }
   0x1   :  { %12 = vsyncpa [#allocation3 + $0x1], 0 }
   0x2   :  { %13 = vsyncpa [#allocation6], 0 }
   0x3   :  { %14 = vsyncpa [#allocation4], 0 }
   0x4   :  { %16 = vsyncpa [#allocation4 + $0x1], 0 }
   0x5   :  { %17 = vsyncpa [#allocation10], 0 }
   0x6   :  { %19 = vsyncpa [#allocation10 + $0x1], 0  ;;  %s951_s15 = smov 0   ;;  %s953_s16 = smov 0  }
   0x7   :  { %s955_s17 = smov 0   ;;  %s957_s18 = smov 0  }
   0x8   :  { %s959_s19 = smov 0   ;;  %s961_s20 = smov 0  }
   0x9 LB: > { %s593_s21 = sadd.s32 4294967295, %s920_s20   ;;  %p595_p0 = scmp.ge.s32.totalorder %s920_s20, 1  ;;  %s920_s20 = sphi %s961_s20, %s25_s20   ;;  %s916_s19 = sphi %s959_s19, %s1132_s19   ;;  %s912_s18 = sphi %s957_s18, %s1131_s18   ;;  %s908_s17 = sphi %s955_s17, %s1130_s17   ;;  %s904_s16 = sphi %s953_s16, %s1129_s16   ;;  %s900_s15 = sphi %s951_s15, %s1128_s15  }
   0xa   : > { %p985_p1 = scmp.eq.s32.totalorder %s593_s21, 0  ;;  %p168_p2 = scmp.lt.s32.totalorder %s920_s20, 3 }
   0xb   : > { %s179_s25 = sshll.u32 %s1119_s1, 4  ;;  %s922_s27 = smov [#allocation5]   ;;  %s180_s25 = int_to_ptr.hbm [resolvable:$true] %s179_s25 }
   0xc   : > { %p993_p3 = pnand %p595_p0, %p168_p2  ;;  %s181_s28 = sshll.u32 %s922_s27, 4  ;;  %s182_s28 = int_to_ptr.vmem [resolvable:$true] %s181_s28 }
   0xd   : > { %p598_p6 = scmp.ge.s32.totalorder %s920_s20, 2  ;;  %s194_s5 = sshll.u32 %s1120_s2, 4  ;;  %s195_s5 = int_to_ptr.hbm [resolvable:$true] %s194_s5 }
   0xe   : > { %p630_p4 = pneg %p993_p3  ;;  %s923_s6 = smov 384  }
   0xf   : > { %s924_s7 = smov 24   ;;  %s925_s8 = smov [#allocation7]  }
  0x10   : > { %p631_p5 = pnand %p630_p4, %p985_p1  ;;  %s196_s9 = sshll.u32 %s925_s8, 4  ;;  %s197_s9 = int_to_ptr.vmem [resolvable:$true] %s196_s9 }
  0x11   : > { %s37_s10 = sadd.s32 1, %s916_s19  ;;  %s594_s11 = sadd.s32 4294967294, %s920_s20  }
  0x12   : > { %633 = dma.hbm_to_vmem [thread:$0]  (!%p631_p5), %s180_s25, 6144, %s182_s28, [#allocation6], %s923_s6, %s923_s6, %s924_s7  }
  0x13   : > { %636 = dma.hbm_to_vmem [thread:$0]  (!%p631_p5), %s195_s5, 48, %s197_s9, [#allocation6]  }
  0x14   : > { %p39_p7 = scmp.ge.s32.totalorder %s37_s10, 2  ;;  %s46_s12 = sadd.s32 1, %s908_s17 }
  0x15   : > { %p53_p8 = scmp.ne.s32.totalorder %s908_s17, %s904_s16  ;;  %p54_p9 = scmp.eq.s32.totalorder %s920_s20, 0 }
  0x16   : > { %s1134_s10 = smov (%p39_p7, %s37_s10), 0  ;;  %p59_p10 = scmp.ne.s32.totalorder %s904_s16, %s900_s15 }
  0x17   : > { %s41_s13 = ssub.s32 %s916_s19, %s1134_s10  ;;  %p127_p11 = scmp.eq.s32.totalorder %s593_s21, 1 }
  0x18   : > { %p44_p12 = scmp.eq.s32.totalorder %s41_s13, 0  ;;  %p1021_p13 = por %p985_p1, %p59_p10 }
  0x19   : > { %p1025_p0 = por %p127_p11, %p53_p8  ;;  %p133_p2 = scmp.eq.s32.totalorder %s594_s11, 1 }
  0x1a   : > { %s1030_s24 = scalar_select %p44_p12, %s908_s17, %s46_s12  }
  0x1b   : > { %p55_p4 = por %p54_p9, %p53_p8  ;;  %p1032_p5 = por %p133_p2, %p59_p10 }
  0x1c   : > { %s207_s27 = sand.u32 1, %s908_s17   ;;  %s600_s21 = sshll.u32 %s916_s19, 3 }
  0x1d   : > { %p650_p7 = scmp.lt.s32.totalorder %s920_s20, 2  ;;  %s599_s28 = sshll.u32 %s207_s27, 3 }
  0x1e   : > { %s216_s5 = scalar_lea.hbm %s1118_s0, %s600_s21  ;;  %s211_s7 = scalar_lea.vmem [#allocation2], %s599_s28 }
  0x1f   : > { %s218_s6 = sshll.u32 %s216_s5, 4  ;;  %s220_s8 = sshll.u32 %s211_s7, 4  ;;  %s219_s6 = int_to_ptr.hbm [resolvable:$true] %s218_s6  ;;  %s221_s8 = int_to_ptr.vmem [resolvable:$true] %s220_s8 }
  0x20   : > { %p638_p11 = pnand %p650_p7, %p55_p4  ;;  %s208_s9 = scalar_lea.sflag [#allocation3], %s207_s27 }
  0x21   : > { %229 = sbr.rel (%p993_p3) target bundleno = 234 (0xea), region = 32  ;;  %s1045_s11 = sand.u32 (!%p993_p3), 1, %s904_s16  }
  0x22   : > { %640 = dma.hbm_to_vmem [thread:$0]  (!%p638_p11), %s219_s6, 128, %s221_s8, %s208_s9  }
  0x23   : > { %s602_s12 = sshll.u32 (!%p993_p3), %s1045_s11, 3  ;;  %s232_s13 = scalar_lea.sflag (!%p993_p3), [#allocation3], %s1045_s11 }
  0x24   : > { %s1051_s21 = scalar_lea.vmem (!%p993_p3), [#allocation2], %s602_s12 }
  0x26   : > { %883 = dma.done.wait (%p1021_p13), %s232_s13, 128  }
  0x27   : > { %885 = vsyncadd (%p1021_p13), %s232_s13, 4294967168 }
  0x28   : > { %887 = dma.done.wait (%p985_p1), [#allocation6], 6192  }
  0x29   : > { %889 = vsyncadd (%p985_p1), [#allocation6], 4294961104  ;;  %v322_v0 = vld [vmem:[#allocation5 + $0x168] sm:$0xff]  ;;  %v319_v1 = vld [vmem:[#allocation5 + $0x150] sm:$0xff]  ;;  %s615_s22 = sshll.u32 %s912_s18, 3  ;;  %s275_s28 = scalar_lea.vmem [#allocation9], %s602_s12 }
  0x2a   : > { %333 = vmatpush.msra.mxu0 %v322_v0  ;;  %v316_v2 = vld [vmem:[#allocation5 + $0x138] sm:$0xff]  ;;  %v323_v3 = vld [vmem:[#allocation5 + $0x170] sm:$0xff]  ;;  %v313_v5 = vld [vmem:[#allocation5 + $0x120] sm:$0xff]  ;;  %s453_s27 = scalar_lea.hbm %s1122_s4, %s615_s22  ;;  %s455_s29 = sshll.u32 %s275_s28, 4  ;;  %s456_s29 = int_to_ptr.vmem [resolvable:$true] %s455_s29 }
  0x2b   : > { %353 = vmatpush.msra.mxu1 %v323_v3  ;;  %v320_v4 = vld [vmem:[#allocation5 + $0x158] sm:$0xff]  ;;  %v317_v7 = vld [vmem:[#allocation5 + $0x140] sm:$0xff]  ;;  %v310_v9 = vld [vmem:[#allocation5 + $0x108] sm:$0xff]  ;;  %s457_s30 = sshll.u32 %s453_s27, 4  ;;  %s425_s5 = scalar_lea.sflag [#allocation10], %s1045_s11  ;;  %s458_s30 = int_to_ptr.hbm [resolvable:$true] %s457_s30 }
  0x2c   : > { %334 = vmatpush.msra.mxu0 %v319_v1  ;;  %v324_v6 = vld [vmem:[#allocation5 + $0x178] sm:$0xff]  ;;  %v321_v8 = vld [vmem:[#allocation5 + $0x160] sm:$0xff]  ;;  %v314_v10 = vld [vmem:[#allocation5 + $0x128] sm:$0xff]  ;;  %s816_s6 = sshra.s32 %s458_s30, 4  ;;  %s822_s12 = scalar_lea.hbm %s1122_s4, 16  ;;  %s817_s6 = int_to_ptr.hbm [resolvable:$true] %s816_s6 }
  0x2d   : > { %354 = vmatpush.msra.mxu1 %v320_v4  ;;  %373 = vmatpush.msra.mxu2 %v324_v6  ;;  %v318_v11 = vld [vmem:[#allocation5 + $0x148] sm:$0xff]  ;;  %v307_v12 = vld [vmem:[#allocation5 + $0xf0] sm:$0xff]  ;;  %v304_v15 = vld [vmem:[#allocation5 + $0xd8] sm:$0xff]  ;;  %s818_s7 = scalar_lea.hbm %s817_s6, 8  ;;  %p823_p9 = scmp.lt.s32.totalorder %s817_s6, %s1122_s4 }
  0x2e   : > { %335 = vmatpush.msra.mxu0 %v316_v2  ;;  %v311_v13 = vld [vmem:[#allocation5 + $0x110] sm:$0xff]  ;;  %v308_v16 = vld [vmem:[#allocation5 + $0xf8] sm:$0xff]  ;;  %v301_v18 = vld [vmem:[#allocation5 + $0xc0] sm:$0xff]  ;;  %p819_p1 = scmp.ne.s32.totalorder %s817_s6, %s818_s7  ;;  %p824_p10 = scmp.lt.s32.totalorder %s822_s12, %s818_s7 }
  0x2f   : > { %355 = vmatpush.msra.mxu1 %v317_v7  ;;  %374 = vmatpush.msra.mxu2 %v321_v8  ;;  %v315_v14 = vld [vmem:[#allocation5 + $0x130] sm:$0xff]  ;;  %v312_v17 = vld [vmem:[#allocation5 + $0x118] sm:$0xff]  ;;  %v305_v19 = vld [vmem:[#allocation5 + $0xe0] sm:$0xff] }
  0x30   : > { %336 = vmatpush.msra.mxu0 %v313_v5  ;;  %v309_v20 = vld [vmem:[#allocation5 + $0x100] sm:$0xff]  ;;  %v298_v21 = vld [vmem:[#allocation5 + $0xa8] sm:$0xff]  ;;  %v295_v24 = vld [vmem:[#allocation5 + $0x90] sm:$0xff]  ;;  %p820_p3 = pnand %p819_p1, %p1025_p0  ;;  %p825_p12 = por %p824_p10, %p823_p9 }
  0x31   : > { %356 = vmatpush.msra.mxu1 %v314_v10  ;;  %375 = vmatpush.msra.mxu2 %v318_v11  ;;  %v302_v22 = vld [vmem:[#allocation5 + $0xc8] sm:$0xff]  ;;  %v299_v25 = vld [vmem:[#allocation5 + $0xb0] sm:$0xff]  ;;  %v292_v27 = vld [vmem:[#allocation5 + $0x78] sm:$0xff] }
  0x32   : > { %337 = vmatpush.msra.mxu0 %v310_v9  ;;  %v306_v23 = vld [vmem:[#allocation5 + $0xe8] sm:$0xff]  ;;  %v303_v26 = vld [vmem:[#allocation5 + $0xd0] sm:$0xff]  ;;  %v296_v28 = vld [vmem:[#allocation5 + $0x98] sm:$0xff]  ;;  %p821_p8 = pneg %p820_p3 }
  0x33   : > { %357 = vmatpush.msra.mxu1 %v311_v13  ;;  %376 = vmatpush.msra.mxu2 %v315_v14  ;;  %v300_v29 = vld [vmem:[#allocation5 + $0xb8] sm:$0xff]  ;;  %v289_v30 = vld [vmem:[#allocation5 + $0x60] sm:$0xff]  ;;  %v286_v33 = vld [vmem:[#allocation5 + $0x48] sm:$0xff] }
  0x34   : > { %338 = vmatpush.msra.mxu0 %v307_v12  ;;  %v293_v31 = vld [vmem:[#allocation5 + $0x80] sm:$0xff]  ;;  %v290_v34 = vld [vmem:[#allocation5 + $0x68] sm:$0xff]  ;;  %v283_v36 = vld [vmem:[#allocation5 + $0x30] sm:$0xff]  ;;  %p826_p13 = pnand %p825_p12, %p821_p8 }
  0x35   : > { %358 = vmatpush.msra.mxu1 %v308_v16  ;;  %377 = vmatpush.msra.mxu2 %v312_v17  ;;  %v297_v32 = vld [vmem:[#allocation5 + $0xa0] sm:$0xff]  ;;  %v294_v35 = vld [vmem:[#allocation5 + $0x88] sm:$0xff]  ;;  %v287_v37 = vld [vmem:[#allocation5 + $0x50] sm:$0xff] }
  0x36   : > { %339 = vmatpush.msra.mxu0 %v304_v15  ;;  %v291_v38 = vld [vmem:[#allocation5 + $0x70] sm:$0xff]  ;;  %v280_v39 = vld [vmem:[#allocation5 + $0x18] sm:$0xff]  ;;  %v277_v42 = vld [vmem:[#allocation5] sm:$0xff] }
  0x37   : > { %359 = vmatpush.msra.mxu1 %v305_v19  ;;  %378 = vmatpush.msra.mxu2 %v309_v20  ;;  %v284_v40 = vld [vmem:[#allocation5 + $0x38] sm:$0xff]  ;;  %v281_v43 = vld [vmem:[#allocation5 + $0x20] sm:$0xff]  ;;  %v278_v46 = vld [vmem:[#allocation5 + $0x8] sm:$0xff] }
  0x38   : > { %340 = vmatpush.msra.mxu0 %v301_v18  ;;  %v288_v41 = vld [vmem:[#allocation5 + $0x58] sm:$0xff]  ;;  %v285_v45 = vld [vmem:[#allocation5 + $0x40] sm:$0xff]  ;;  %v282_v47 = vld [vmem:[#allocation5 + $0x28] sm:$0xff] }
  0x39   : > { %360 = vmatpush.msra.mxu1 %v302_v22  ;;  %379 = vmatpush.msra.mxu2 %v306_v23  ;;  %v276_v44 = vld [vmem:[%s1051_s21] sm:$0xff]  ;;  %v325_v49 = vld [vmem:[#allocation7] sm:$0x7] }
  0x3a   : > { %341 = vmatpush.msra.mxu0 %v298_v21  ;;  %v279_v48 = vld [vmem:[#allocation5 + $0x10] sm:$0xff]  ;;  %v327_v50 = vperm.slane %v325_v49, 0  ;;  %v328_v51 = vperm.slane %v325_v49, 1  ;;  %v329_v58 = vperm.slane %v325_v49, 2 }
  0x3b   : > { %361 = vmatpush.msra.mxu1 %v299_v25  ;;  %380 = vmatpush.msra.mxu2 %v303_v26 }
  0x3c   : > { %342 = vmatpush.msra.mxu0 %v295_v24 }
  0x3d   : > { %362 = vmatpush.msra.mxu1 %v296_v28  ;;  %381 = vmatpush.msra.mxu2 %v300_v29 }
  0x3e   : > { %343 = vmatpush.msra.mxu0 %v292_v27 }
  0x3f   : > { %363 = vmatpush.msra.mxu1 %v293_v31  ;;  %382 = vmatpush.msra.mxu2 %v297_v32 }
  0x40   : > { %344 = vmatpush.msra.mxu0 %v289_v30 }
  0x41   : > { %364 = vmatpush.msra.mxu1 %v290_v34  ;;  %383 = vmatpush.msra.mxu2 %v294_v35 }
  0x42   : > { %345 = vmatpush.msra.mxu0 %v286_v33 }
  0x43   : > { %365 = vmatpush.msra.mxu1 %v287_v37  ;;  %384 = vmatpush.msra.mxu2 %v291_v38 }
  0x44   : > { %346 = vmatpush.msra.mxu0 %v283_v36 }
  0x45   : > { %366 = vmatpush.msra.mxu1 %v284_v40  ;;  %385 = vmatpush.msra.mxu2 %v288_v41 }
  0x46   : > { %347 = vmatpush.msra.mxu0 %v280_v39 }
  0x47   : > { %367 = vmatpush.msra.mxu1 %v281_v43  ;;  %386 = vmatpush.msra.mxu2 %v285_v45 }
  0x48   : > { %348 = vmatpush.msra.mxu0 %v277_v42 }
  0x49   : > { %349 = vmatmul.f32.vlgmr.msra.gmra.mxu0 %v276_v44  ;;  %368 = vmatpush.msra.mxu1 %v278_v46 }
  0x4a   : > { %369 = vmatmul.f32.vlgmr.msra.gmra.mxu1 %v276_v44  ;;  %387 = vmatpush.msra.mxu2 %v282_v47 }
  0x4c   : > { %388 = vmatpush.msra.mxu2 %v279_v48 }
  0x4d   : > { %389 = vmatmul.f32.vlgmr.msra.gmra.mxu2 %v276_v44 }
  0xc6   : > { %v350_v52 = vpop.f32.mrf.mxu0 }
  0xc7   : > { %v351_v53 = vadd.f32 %v350_v52, %v327_v50  ;;  %v370_v54 = vpop.f32.mrf.mxu1 }
  0xc8   : > { %v371_v56 = vadd.f32 %v370_v54, %v328_v51 }
  0xc9   : > { %v607_v55 = vmul.f32 -1.442695, %v351_v53 }
  0xca   : > { %v414_v57 = vmul.f32 1.442695, %v371_v56 }
  0xcb   : > { %706 = vpow2.f32 %v607_v55 }
  0xcc   : > { %708 = vpow2.f32 %v414_v57 }
  0xd0   : > { %v390_v60 = vpop.f32.mrf.mxu2 }
  0xd1   : > { %v707_v59 = vpop.eup %706  ;;  %v391_v62 = vadd.f32 %v390_v60, %v329_v58 }
  0xd2   : > { %v396_v61 = vadd.f32 1.0, %v707_v59  ;;  %v709_v63 = vpop.eup %708 }
  0xd3   : > { %v416_v0 = vmul.f32 %v709_v63, %v391_v62 }
  0xd4   : > { %710 = vrcp.f32 %v396_v61 }
  0xd5   : > { %v417_v1 = vpack.c.bf16 %v709_v63, %v416_v0 }
  0xd7   : > { %418 = vst [vmem:[%s275_s28] sm:$0xff] %v417_v1 }
  0xd8   : > { %829 = shalt.err (!%p826_p13)
}
  0xd9   : > { %627 = dma.vmem_to_hbm [thread:$0]  (%p1025_p0), %s456_s29, 128, %s458_s30, %s425_s5   ;;  %v408_v5 = vand.u32 2147483648, %v396_v61  ;;  %v406_v7 = vand.u32 2147483647, %v396_v61  ;;  %vm402_vm1 = vweird.f32 %v396_v61 }
  0xda   : > { %v711_v2 = vpop.eup %710  ;;  %s605_s22 = sshll.u32 %s1045_s11, 2  ;;  %s610_s26 = sshll.u32 %s912_s18, 2 }
  0xdb   : > { %v398_v3 = vmul.f32 %v711_v2, %v396_v61  ;;  %vm403_vm0 = vweird.f32 %v711_v2  ;;  %s436_s28 = scalar_lea.hbm %s1121_s3, %s610_s26  ;;  %v409_v9 = vor.u32 1.1754944e-38, %v408_v5  ;;  %s268_s29 = scalar_lea.vmem [#allocation8], %s605_s22  ;;  %vm407_vm3 = vcmp.eq.f32.partialorder %v406_v7, 8.507059e+37 }
  0xdc   : > { %vm404_vm2 = vmor %vm402_vm1, %vm403_vm0  ;;  %s438_s30 = sshll.u32 %s268_s29, 4  ;;  %s440_s5 = sshll.u32 %s436_s28, 4  ;;  %s439_s30 = int_to_ptr.vmem [resolvable:$true] %s438_s30  ;;  %s441_s5 = int_to_ptr.hbm [resolvable:$true] %s440_s5 }
  0xdd   : > { %v399_v4 = vsub.f32 1.0, %v398_v3  ;;  %s420_s18 = scalar_lea.sflag [#allocation4], %s1045_s11  ;;  %s844_s6 = sshra.s32 %s441_s5, 4  ;;  %s845_s6 = int_to_ptr.hbm [resolvable:$true] %s844_s6 }
  0xde   : > { %s846_s7 = scalar_lea.hbm %s845_s6, 4  ;;  %s850_s12 = scalar_lea.hbm %s1121_s3, 8 }
  0xdf   : > { %v400_v6 = vmul.f32 %v711_v2, %v399_v4  ;;  %p847_p2 = scmp.ne.s32.totalorder %s845_s6, %s846_s7  ;;  %p851_p11 = scmp.lt.s32.totalorder %s845_s6, %s1121_s3 }
  0xe0   : > { %p852_p1 = scmp.lt.s32.totalorder %s850_s12, %s846_s7 }
  0xe1   : > { %v401_v8 = vadd.f32 %v711_v2, %v400_v6  ;;  %p848_p4 = pnand %p847_p2, %p1025_p0 }
  0xe2   : > { %p853_p3 = por %p852_p1, %p851_p11 }
  0xe3   : > { %v405_v10 = vsel %vm404_vm2, %v711_v2, %v401_v8  ;;  %p849_p7 = pneg %p848_p4 }
  0xe4   : > { %v410_v11 = vsel %vm407_vm3, %v409_v9, %v405_v10 }
  0xe5   : > { %v412_v12 = vpack.c.bf16 %v410_v11, %v410_v11  ;;  %p854_p8 = pnand %p853_p3, %p849_p7 }
  0xe7   : > { %413 = vst [vmem:[%s268_s29] sm:$0xf] %v412_v12 }
  0xe8   : > { %857 = shalt.err (!%p854_p8)
}
  0xe9   : > { %626 = dma.vmem_to_hbm [thread:$0]  (%p1025_p0), %s439_s30, 64, %s441_s5, %s420_s18  }
  0xea PF: > { %s469_s11 = sand.u32 1, %s900_s15   ;;  %p642_p9 = pnand %p598_p6, %p1032_p5 }
  0xeb   : > { %s470_s22 = scalar_lea.sflag [#allocation4], %s469_s11 }
  0xec   : > { %p643_p10 = pneg %p642_p9 }
  0xee   : > { %891 = dma.done.wait (%p643_p10), %s470_s22, 64  }
  0xef   : > { %893 = vsyncadd (%p643_p10), %s470_s22, 4294967232  ;;  %s480_s26 = scalar_lea.sflag [#allocation10], %s469_s11 }
  0xf0   : > { %895 = dma.done.wait (%p643_p10), %s480_s26, 128  }
  0xf1   : > { %897 = vsyncadd (%p643_p10), %s480_s26, 4294967168  ;;  %s25_s20 = sadd.s32 1, %s920_s20   ;;  %s1128_s15 = smov %s904_s16 }
  0xf2   : > { %p22_p12 = scmp.ge.s32.totalorder %s25_s20, 4   ;;  %s1129_s16 = smov %s908_s17 }
  0xf3   : > { %s1130_s17 = smov %s1030_s24  ;;  %s1131_s18 = smov %s916_s19 }
  0xf4   : > { %s1132_s19 = smov %s1134_s10  ;;  %24 = sbr.rel (!%p22_p12) target bundleno = 9 (0x9), region = 102 }
  0xf9   :  { %486 = vsyncpa [#allocation3], 1 }
  0xfa   :  { %488 = vsyncpa [#allocation3 + $0x1], 1 }
  0xfb   :  { %489 = vsyncpa [#allocation6], 1 }
  0xfc   :  { %490 = vsyncpa [#allocation4], 1 }
  0xfd   :  { %492 = vsyncpa [#allocation4 + $0x1], 1 }
  0xfe   :  { %493 = vsyncpa [#allocation10], 1 }
  0xff   :  { %495 = vsyncpa [#allocation10 + $0x1], 1 }

</bundles_post_ra>
